<compile_context>
chip_gen: v5e
topology: v5e:2x2
jax: 0.10.0
libtpu: 0.0.40
codegen_flags: <defaults>
</compile_context>

<pallas_src>
import jax
import jax.numpy as jnp
from jax.experimental import pallas as pl
from jax.experimental.pallas import tpu as pltpu


# ----------------------------------------------------------------------------- kernel

def _transpose_kernel(x_ref, o_ref):
    # x_ref: (bb, tm, tn)  ->  o_ref: (bb, tn, tm). Lowers to per-slice XLU transposes.
    o_ref[...] = jnp.swapaxes(x_ref[...], 1, 2)


# --------------------------------------------------------------------------- tiling

_VMEM_BUDGET = 12 * 1024 * 1024   # 2 in + 2 out double-buffered tiles; fits every gen's default
_STEP_TARGET = 1 * 1024 * 1024    # aim to move >= ~1 MiB (read + write) per grid step
_MIN_PALLAS_BYTES = 1 << 20       # below this, pallas_call fixed cost dominates -> XLA
_MIN_LANE_DIM = 128               # below this the output stores are lane-sparse -> XLA


def _round_tile(dim, cap):
    """Largest legal tile extent <= cap along a transposed axis.

    Full-dim extents are always legal block shapes; otherwise use a multiple of 128,
    which is legal on both the lane and the sublane block position for every dtype
    (f32 needs 8, bf16 needs 16, int8/fp8 need 32 on the sublane axis)."""
    if dim <= cap:
        return dim
    return max(128, (cap // 128) * 128)


def _shrink_tile(t):
    return max(128, ((t // 2) // 128) * 128)


def _pick_tiles(B, M, N, itemsize, tile_cap):
    tm = _round_tile(M, tile_cap)
    tn = _round_tile(N, tile_cap)
    # Cap the double-buffered VMEM footprint: 2*(bb,tm,tn) + 2*(bb,tn,tm) tiles.
    while 4 * tm * tn * itemsize > _VMEM_BUDGET and max(tm, tn) > 128:
        if tn >= tm:
            tn = _shrink_tile(tn)
        else:
            tm = _shrink_tile(tm)
    # Batch blocking: when the transposed tiles are small, pull several batch elements
    # per grid step so each step moves >= ~1 MiB of HBM traffic.
    bb = 1
    tile_bytes = tm * tn * itemsize
    while (bb * 2 <= B
           and 2 * bb * tile_bytes < _STEP_TARGET
           and 4 * (bb * 2) * tile_bytes <= _VMEM_BUDGET):
        bb *= 2
    return bb, tm, tn


def _pallas_batched_transpose(x3, tile_cap=1024):
    """(B, M, N) -> (B, N, M) via a tiled Pallas transpose kernel."""
    B, M, N = x3.shape
    bb, tm, tn = _pick_tiles(B, M, N, x3.dtype.itemsize, tile_cap)

    # Last grid axis sweeps M-blocks so consecutive steps advance along the output's
    # last (lane) dimension -> lane-dense HBM writeback. cdiv grid + implicit masking
    # handle partial tail blocks in every direction.
    grid = (pl.cdiv(B, bb), pl.cdiv(N, tn), pl.cdiv(M, tm))
    nbytes = x3.size * x3.dtype.itemsize

    return pl.pallas_call(
        _transpose_kernel,
        out_shape=jax.ShapeDtypeStruct((B, N, M), x3.dtype),
        grid_spec=pltpu.PrefetchScalarGridSpec(
            num_scalar_prefetch=0,
            grid=grid,
            in_specs=[pl.BlockSpec((bb, tm, tn), lambda b, j, i: (b, i, j))],
            out_specs=pl.BlockSpec((bb, tn, tm), lambda b, j, i: (b, j, i)),
        ),
        compiler_params=pltpu.CompilerParams(
            dimension_semantics=("parallel", "parallel", "parallel"),
        ),
        cost_estimate=pl.CostEstimate(
            flops=0, transcendentals=0, bytes_accessed=2 * nbytes),
    )(x3)


# ------------------------------------------------------------------------ shape logic

def _simplify_permutation(shape, dims):
    """Drop size-1 axes and merge adjacent axes that stay adjacent & in-order.

    Returns (coalesced_source_shape, coalesced_perm)."""
    nd = len(shape)
    keep = [a for a in range(nd) if shape[a] != 1]
    remap = {a: i for i, a in enumerate(keep)}
    shape1 = [shape[a] for a in keep]
    perm1 = [remap[d] for d in dims if shape[d] != 1]

    # Group consecutive destination entries that are consecutive source axes.
    groups = []
    for d in perm1:
        if groups and d == groups[-1][-1] + 1:
            groups[-1].append(d)
        else:
            groups.append([d])

    # Rank groups by their position in the *source* order.
    src_order = sorted(range(len(groups)), key=lambda g: groups[g][0])
    rank = {g: r for r, g in enumerate(src_order)}

    new_shape = [1] * len(groups)
    for g_idx, g in enumerate(groups):
        sz = 1
        for a in g:
            sz *= shape1[a]
        new_shape[rank[g_idx]] = sz
    new_perm = tuple(rank[g_idx] for g_idx in range(len(groups)))
    return tuple(new_shape), new_perm


def permute_forward(x, dims, make_contiguous=False, force_pallas=False):
    """JAX/Pallas equivalent of EmoDubber Permute.forward: x.permute(dims)[.contiguous()].

    `make_contiguous` is a no-op in JAX (outputs are always dense)."""
    del make_contiguous
    nd = x.ndim
    dims = tuple(int(d) % nd for d in dims)
    out_shape = tuple(x.shape[d] for d in dims)

    new_shape, new_perm = _simplify_permutation(x.shape, dims)

    # Data order unchanged -> pure metadata, no kernel, no HBM traffic.
    if new_perm == tuple(range(len(new_perm))):
        return jnp.reshape(x, out_shape)

    if new_perm in ((1, 0), (0, 2, 1)):
        if new_perm == (1, 0):
            B, (M, N) = 1, new_shape
        else:
            B, M, N = new_shape
        nbytes = x.size * x.dtype.itemsize
        use_pallas = force_pallas or (min(M, N) >= _MIN_LANE_DIM
                                      and nbytes >= _MIN_PALLAS_BYTES)
        if use_pallas:
            y = _pallas_batched_transpose(jnp.reshape(x, (B, M, N)))
            return jnp.reshape(y, out_shape)
        # Small or lane-sparse shapes: masked stores + kernel fixed cost dominate,
        # XLA's fused transpose wins on every TPU generation.
        return jnp.transpose(x, dims)

    # TODO(synk): permutations that coalesce to >2 swapped groups (e.g. (2,0,1)) have no
    # single batched-2D transpose; fall back to XLA transpose.
    return jnp.transpose(x, dims)


# ------------------------------------------------------------------------------- main

if __name__ == "__main__":
    key = jax.random.PRNGKey(0)
    k1, k2, k3, k4, k5 = jax.random.split(key, 5)

    # Case 1: 4-D NCHW -> NHWC at the module's typical small shape.
    # Coalesces to (B, C, H*W) with C=4 < 128 -> dispatch threshold routes to XLA.
    x1 = jax.random.normal(k1, (2, 4, 16, 16), dtype=jnp.float32)
    y1 = permute_forward(x1, (0, 2, 3, 1))
    jax.block_until_ready(y1)
    assert y1.shape == (2, 16, 16, 4)
    assert jnp.array_equal(y1, jnp.transpose(x1, (0, 2, 3, 1)))

    # Case 2: typical EmoDubber Permute((0, 2, 1)) on a small (B, C, T) tensor.
    x2 = jax.random.normal(k2, (2, 32, 64), dtype=jnp.float32)
    y2 = permute_forward(x2, (0, 2, 1), make_contiguous=True)
    jax.block_until_ready(y2)
    assert y2.shape == (2, 64, 32)
    assert jnp.array_equal(y2, jnp.transpose(x2, (0, 2, 1)))

    # Case 3: Pallas path — above the dispatch threshold, full-dim tiles, grid=(2,1,1).
    x3 = jax.random.normal(k3, (2, 256, 640), dtype=jnp.float32)
    y3 = permute_forward(x3, (0, 2, 1), make_contiguous=True)
    jax.block_until_ready(y3)
    assert y3.shape == (2, 640, 256)
    assert jnp.array_equal(y3, jnp.transpose(x3, (0, 2, 1)))

    # Case 4: Pallas path forced on a small plain 2-D transpose (full-dim tiles).
    x4 = jax.random.normal(k4, (48, 160), dtype=jnp.float32)
    y4 = permute_forward(x4, (1, 0), force_pallas=True)
    jax.block_until_ready(y4)
    assert y4.shape == (160, 48)
    assert jnp.array_equal(y4, jnp.transpose(x4, (1, 0)))

    # Case 5: masked tails on both transposed axes + batch blocking (bb=2), tile cap 128.
    x5 = jax.random.normal(k5, (2, 200, 168), dtype=jnp.float32)
    y5 = _pallas_batched_transpose(x5, tile_cap=128)
    jax.block_until_ready(y5)
    assert y5.shape == (2, 168, 200)
    assert jnp.array_equal(y5, jnp.transpose(x5, (0, 2, 1)))

    # Case 6: identity permutation -> metadata only, no kernel launched.
    y6 = permute_forward(x2, (0, 1, 2))
    jax.block_until_ready(y6)
    assert jnp.array_equal(y6, x2)

    print("KERNEL_OK")
</pallas_src>

<mosaic_0001>
module attributes {stable_mosaic.version = 11 : i64} {
  func.func @_transpose_kernel(%arg0: i32, %arg1: i32, %arg2: i32, %arg3: memref<1x256x640xf32, #tpu.memory_space<vmem>>, %arg4: memref<1x640x256xf32, #tpu.memory_space<vmem>>) attributes {dimension_semantics = [#tpu.dimension_semantics<parallel>, #tpu.dimension_semantics<parallel>, #tpu.dimension_semantics<parallel>], iteration_bounds = array<i64: 2, 1, 1>, scalar_prefetch = 0 : i64, scratch_operands = 0 : i64, tpu.core_type = #tpu.core_type<tc>, window_params = [{transform_indices = @transform_0, window_bounds = array<i64: 1, 256, 640>}, {transform_indices = @transform_1, window_bounds = array<i64: 1, 640, 256>}]} {
    %c0 = arith.constant 0 : index
    %c0_0 = arith.constant 0 : index
    %c0_1 = arith.constant 0 : index
    %0 = vector.load %arg3[%c0, %c0_0, %c0_1] : memref<1x256x640xf32, #tpu.memory_space<vmem>>, vector<1x256x640xf32>
    %1 = tpu.transpose %0, [0, 2, 1] : vector<1x256x640xf32> -> vector<1x640x256xf32>
    %c0_2 = arith.constant 0 : index
    %c0_3 = arith.constant 0 : index
    %c0_4 = arith.constant 0 : index
    %2 = vector.load %arg4[%c0_2, %c0_3, %c0_4] : memref<1x640x256xf32, #tpu.memory_space<vmem>>, vector<1x640x256xf32>
    tpu.vector_store %arg4[%c0_2, %c0_3, %c0_4], %1 {strides = array<i32>} : memref<1x640x256xf32, #tpu.memory_space<vmem>>, vector<1x640x256xf32>,
    return
  }
  func.func @transform_0(%arg0: i32, %arg1: i32, %arg2: i32) -> (i32, i32, i32) {
    %c0_i32 = arith.constant 0 : i32
    return %arg0, %arg2, %arg1 : i32, i32, i32
  }
  func.func @transform_1(%arg0: i32, %arg1: i32, %arg2: i32) -> (i32, i32, i32) {
    %c0_i32 = arith.constant 0 : i32
    return %arg0, %arg1, %arg2 : i32, i32, i32
  }
}

</mosaic_0001>

<bundles_post_ra>
// kernel: tpu_custom_call.1
= control target key start
LH: loop header
LB: loop body
LE: loop exit
PB: predicated region body
PF: predicated region fallthrough
CT: control target
= control target key end

     0   :  { %6 = vsyncpa [#allocation3], 0  ;;  %s1584_s0 = inlined_call_operand.hbm [shape: f32[2,256,640], index: 0, kind: input, shape index: {}]   ;;  %s1585_s1 = inlined_call_operand.hbm [shape: f32[2,640,256], index: 1, kind: output, shape index: {}]  }
   0x1   :  { %8 = vsyncpa [#allocation3 + $0x1], 0 }
   0x2   :  { %9 = vsyncpa [#allocation4], 0 }
   0x3   :  { %11 = vsyncpa [#allocation4 + $0x1], 0  ;;  %s1135_s6 = smov 0   ;;  %s1137_s7 = smov 0  }
   0x4   :  { %s1139_s8 = smov 0   ;;  %s1141_s9 = smov 0  }
   0x5   :  { %s1143_s10 = smov 0   ;;  %s1145_s11 = smov 0  }
   0x6 LB: > { %s928_s12 = sadd.s32 4294967295, %s1119_s11   ;;  %s929_s13 = sadd.s32 4294967294, %s1119_s11   ;;  %s1119_s11 = sphi %s1145_s11, %s17_s11   ;;  %s1115_s10 = sphi %s1143_s10, %s1594_s10   ;;  %s1111_s9 = sphi %s1141_s9, %s1593_s9   ;;  %s1107_s8 = sphi %s1139_s8, %s1592_s8   ;;  %s1103_s7 = sphi %s1137_s7, %s1591_s7   ;;  %s1099_s6 = sphi %s1135_s6, %s1590_s6  }
   0x7   : > { %s36_s14 = sadd.s32 1, %s1115_s10  ;;  %s47_s15 = sadd.s32 1, %s1107_s8 }
   0x8   : > { %p38_p0 = scmp.ge.s32.totalorder %s36_s14, 2  ;;  %p54_p1 = scmp.ne.s32.totalorder %s1107_s8, %s1103_s7 }
   0x9   : > { %p55_p2 = scmp.eq.s32.totalorder %s1119_s11, 0  ;;  %p60_p3 = scmp.ne.s32.totalorder %s1103_s7, %s1099_s6 }
   0xa   : > { %s1596_s14 = smov (%p38_p0, %s36_s14), 0  ;;  %p61_p5 = scmp.eq.s32.totalorder %s928_s12, 0 }
   0xb   : > { %p1176_p4 = por %p55_p2, %p54_p1  ;;  %s40_s17 = ssub.s32 %s1115_s10, %s1596_s14 }
   0xc   : > { %p88_p6 = scmp.eq.s32.totalorder %s928_s12, 1  ;;  %p45_p7 = scmp.eq.s32.totalorder %s40_s17, 0 }
   0xd   : > { %p1182_p8 = por %p61_p5, %p60_p3  ;;  %p94_p10 = scmp.eq.s32.totalorder %s929_s13, 1 }
   0xe   : > { %p1186_p9 = por %p88_p6, %p54_p1  ;;  %p931_p12 = scmp.ge.s32.totalorder %s1119_s11, 2 }
   0xf   : > { %s1191_s20 = scalar_select %p45_p7, %s1107_s8, %s47_s15  }
  0x10   : > { %p1193_p11 = por %p94_p10, %p60_p3  ;;  %p953_p13 = scmp.lt.s32.totalorder %s1119_s11, 2 }
  0x11   : > { %s114_s22 = sand.u32 1, %s1107_s8   ;;  %s938_s24 = smul.u32 1280, %s1115_s10 }
  0x12   : > { %s937_s23 = smul.u32 1280, %s114_s22  ;;  %p946_p0 = pnand %p953_p13, %p1176_p4 }
  0x13   : > { %s128_s27 = scalar_lea.hbm %s1584_s0, %s938_s24  ;;  %p933_p1 = scmp.ge.s32.totalorder %s1119_s11, 1 }
  0x14   : > { %s118_s28 = scalar_lea.vmem [#allocation2], %s937_s23  ;;  %s129_s30 = sshll.u32 %s128_s27, 4  ;;  %s130_s30 = int_to_ptr.hbm [resolvable:$true] %s129_s30 }
  0x15   : > { %s131_s29 = sshll.u32 %s118_s28, 4  ;;  %s115_s2 = scalar_lea.sflag [#allocation3], %s114_s22  ;;  %s132_s29 = int_to_ptr.vmem [resolvable:$true] %s131_s29 }
  0x16   : > { %s1121_s3 = smov 640   ;;  %s1122_s4 = smov 40  }
  0x17   : > { %948 = dma.hbm_to_vmem [thread:$0]  (!%p946_p0), %s130_s30, 20480, %s132_s29, %s115_s2, %s1121_s3, %s1121_s3, %s1122_s4  }
  0x18   : > { %p139_p2 = scmp.lt.s32.totalorder %s1119_s11, 3 }
  0x1a   : > { %p140_p3 = pnand %p933_p1, %p139_p2 }
  0x1b   : > { %s1209_s5 = sand.u32 (!%p140_p3), 1, %s1103_s7  }
  0x1c   : > { %143 = sbr.rel (%p140_p3) target bundleno = 708 (0x2c4), region = 24  ;;  %s146_s13 = scalar_lea.sflag (!%p140_p3), [#allocation3], %s1209_s5 }
  0x1d   : > { %s939_s12 = smul.u32 (!%p140_p3), 1280, %s1209_s5 }
  0x1f   : > { %s1215_s15 = scalar_lea.vmem (!%p140_p3), [#allocation2], %s939_s12 }
  0x21   : > { %1090 = dma.done.wait (%p1182_p8), %s146_s13, 20480  }
  0x22   : > { %1092 = vsyncadd (%p1182_p8), %s146_s13, 4294946816  ;;  %v173_v0 = vld [vmem:[%s1215_s15] sm:$0xff]  ;;  %v178_v1 = vld [vmem:[%s1215_s15 + $0x28] sm:$0xff]  ;;  %s1261_s16 = scalar_lea.vmem [#allocation5], %s939_s12  ;;  %s940_s17 = smul.u32 1280, %s1111_s9 }
  0x23   : > { %333 = vxpose.xlu0.b32.start [1/16] %v173_v0, 128  ;;  %v183_v2 = vld [vmem:[%s1215_s15 + $0x50] sm:$0xff]  ;;  %v188_v3 = vld [vmem:[%s1215_s15 + $0x78] sm:$0xff]  ;;  %v193_v4 = vld [vmem:[%s1215_s15 + $0xa0] sm:$0xff]  ;;  %s831_s24 = sshll.u32 %s1261_s16, 4  ;;  %s814_s26 = scalar_lea.sflag [#allocation4], %s1209_s5  ;;  %s832_s24 = int_to_ptr.vmem [resolvable:$true] %s831_s24 }
  0x24   : > { %v198_v5 = vld [vmem:[%s1215_s15 + $0xc8] sm:$0xff]  ;;  %v203_v6 = vld [vmem:[%s1215_s15 + $0xf0] sm:$0xff]  ;;  %v208_v7 = vld [vmem:[%s1215_s15 + $0x118] sm:$0xff]  ;;  %s830_s23 = scalar_lea.hbm %s1585_s1, %s940_s17  ;;  %s1057_s30 = scalar_lea.hbm %s1585_s1, 2560 }
  0x25   : > { %v213_v8 = vld [vmem:[%s1215_s15 + $0x140] sm:$0xff]  ;;  %v218_v9 = vld [vmem:[%s1215_s15 + $0x168] sm:$0xff]  ;;  %v223_v10 = vld [vmem:[%s1215_s15 + $0x190] sm:$0xff]  ;;  %s833_s25 = sshll.u32 %s830_s23, 4  ;;  %s834_s25 = int_to_ptr.hbm [resolvable:$true] %s833_s25 }
  0x26   : > { %v228_v11 = vld [vmem:[%s1215_s15 + $0x1b8] sm:$0xff]  ;;  %v174_v12 = vld [vmem:[%s1215_s15 + $0x8] sm:$0xff]  ;;  %v233_v13 = vld [vmem:[%s1215_s15 + $0x1e0] sm:$0xff]  ;;  %s1051_s27 = sshra.s32 %s834_s25, 4  ;;  %s1052_s27 = int_to_ptr.hbm [resolvable:$true] %s1051_s27 }
  0x27   : > { %365 = vxpose.xlu1.b32.start [1/16] %v174_v12, 128  ;;  %v179_v14 = vld [vmem:[%s1215_s15 + $0x30] sm:$0xff]  ;;  %v238_v15 = vld [vmem:[%s1215_s15 + $0x208] sm:$0xff]  ;;  %v184_v17 = vld [vmem:[%s1215_s15 + $0x58] sm:$0xff]  ;;  %s1053_s28 = scalar_lea.hbm %s1052_s27, 1280  ;;  %p1058_p7 = scmp.lt.s32.totalorder %s1052_s27, %s1585_s1 }
  0x28   : > { %v175_v16 = vld [vmem:[%s1215_s15 + $0x10] sm:$0xff]  ;;  %v180_v19 = vld [vmem:[%s1215_s15 + $0x38] sm:$0xff]  ;;  %v189_v20 = vld [vmem:[%s1215_s15 + $0x80] sm:$0xff]  ;;  %p1054_p4 = scmp.ne.s32.totalorder %s1052_s27, %s1053_s28  ;;  %p1059_p8 = scmp.lt.s32.totalorder %s1057_s30, %s1053_s28 }
  0x29   : > { %397 = vxpose.xlu2.b32.start [1/16] %v175_v16, 128  ;;  %v243_v18 = vld [vmem:[%s1215_s15 + $0x230] sm:$0xff]  ;;  %v248_v21 = vld [vmem:[%s1215_s15 + $0x258] sm:$0xff]  ;;  %v185_v22 = vld [vmem:[%s1215_s15 + $0x60] sm:$0xff] }
  0x2a   : > { %v194_v23 = vld [vmem:[%s1215_s15 + $0xa8] sm:$0xff]  ;;  %v176_v24 = vld [vmem:[%s1215_s15 + $0x18] sm:$0xff]  ;;  %v181_v26 = vld [vmem:[%s1215_s15 + $0x40] sm:$0xff]  ;;  %p1055_p5 = pnand %p1054_p4, %p1186_p9  ;;  %p1060_p10 = por %p1059_p8, %p1058_p7 }
  0x2b   : > { %334 = vxpose.xlu0.b32.cont [2/16] %v178_v1, 128  ;;  %v190_v25 = vld [vmem:[%s1215_s15 + $0x88] sm:$0xff]  ;;  %v199_v27 = vld [vmem:[%s1215_s15 + $0xd0] sm:$0xff]  ;;  %v204_v30 = vld [vmem:[%s1215_s15 + $0xf8] sm:$0xff] }
  0x2c   : > { %v195_v28 = vld [vmem:[%s1215_s15 + $0xb0] sm:$0xff]  ;;  %v186_v29 = vld [vmem:[%s1215_s15 + $0x68] sm:$0xff]  ;;  %v200_v31 = vld [vmem:[%s1215_s15 + $0xd8] sm:$0xff]  ;;  %p1056_p6 = pneg %p1055_p5 }
  0x2d   : > { %v191_v32 = vld [vmem:[%s1215_s15 + $0x90] sm:$0xff]  ;;  %v209_v33 = vld [vmem:[%s1215_s15 + $0x120] sm:$0xff]  ;;  %v196_v35 = vld [vmem:[%s1215_s15 + $0xb8] sm:$0xff] }
  0x2e   : > { %v205_v34 = vld [vmem:[%s1215_s15 + $0x100] sm:$0xff]  ;;  %v214_v36 = vld [vmem:[%s1215_s15 + $0x148] sm:$0xff]  ;;  %v219_v40 = vld [vmem:[%s1215_s15 + $0x170] sm:$0xff]  ;;  %p1061_p13 = pnand %p1060_p10, %p1056_p6 }
  0x2f   : > { %366 = vxpose.xlu1.b32.cont [2/16] %v179_v14, 128  ;;  %v210_v37 = vld [vmem:[%s1215_s15 + $0x128] sm:$0xff]  ;;  %v201_v39 = vld [vmem:[%s1215_s15 + $0xe0] sm:$0xff]  ;;  %v215_v41 = vld [vmem:[%s1215_s15 + $0x150] sm:$0xff] }
  0x30   : > { %v206_v43 = vld [vmem:[%s1215_s15 + $0x108] sm:$0xff]  ;;  %v224_v44 = vld [vmem:[%s1215_s15 + $0x198] sm:$0xff]  ;;  %v211_v47 = vld [vmem:[%s1215_s15 + $0x130] sm:$0xff] }
  0x31   : > { %398 = vxpose.xlu2.b32.cont [2/16] %v180_v19, 128  ;;  %v220_v45 = vld [vmem:[%s1215_s15 + $0x178] sm:$0xff]  ;;  %v229_v48 = vld [vmem:[%s1215_s15 + $0x1c0] sm:$0xff]  ;;  %v234_v52 = vld [vmem:[%s1215_s15 + $0x1e8] sm:$0xff] }
  0x32   : > { %v225_v49 = vld [vmem:[%s1215_s15 + $0x1a0] sm:$0xff]  ;;  %v216_v51 = vld [vmem:[%s1215_s15 + $0x158] sm:$0xff]  ;;  %v230_v53 = vld [vmem:[%s1215_s15 + $0x1c8] sm:$0xff] }
  0x33   : > { %335 = vxpose.xlu0.b32.cont [3/16] %v183_v2, 128  ;;  %v221_v55 = vld [vmem:[%s1215_s15 + $0x180] sm:$0xff]  ;;  %v239_v56 = vld [vmem:[%s1215_s15 + $0x210] sm:$0xff]  ;;  %v226_v59 = vld [vmem:[%s1215_s15 + $0x1a8] sm:$0xff] }
  0x34   : > { %v235_v57 = vld [vmem:[%s1215_s15 + $0x1f0] sm:$0xff]  ;;  %v244_v60 = vld [vmem:[%s1215_s15 + $0x238] sm:$0xff]  ;;  %v249_v0 = vld [vmem:[%s1215_s15 + $0x260] sm:$0xff] }
  0x35   : > { %v240_v61 = vld [vmem:[%s1215_s15 + $0x218] sm:$0xff]  ;;  %v231_v63 = vld [vmem:[%s1215_s15 + $0x1d0] sm:$0xff]  ;;  %v245_v1 = vld [vmem:[%s1215_s15 + $0x240] sm:$0xff] }
  0x36   : > { %v187_v12 = vld [vmem:[%s1215_s15 + $0x70] sm:$0xff]  ;;  %v192_v16 = vld [vmem:[%s1215_s15 + $0x98] sm:$0xff]  ;;  %v254_v19 = vld [vmem:[%s1215_s15 + $0x288] sm:$0xff] }
  0x37   : > { %367 = vxpose.xlu1.b32.cont [3/16] %v184_v17, 128  ;;  %v263_v17 = vld [vmem:[%s1215_s15 + $0x2d0] sm:$0xff] }
  0x39   : > { %399 = vxpose.xlu2.b32.cont [3/16] %v185_v22, 128 }
  0x3b   : > { %336 = vxpose.xlu0.b32.cont [4/16] %v188_v3, 128  ;;  %v236_v3 = vld [vmem:[%s1215_s15 + $0x1f8] sm:$0xff] }
  0x3f   : > { %368 = vxpose.xlu1.b32.cont [4/16] %v189_v20, 128  ;;  %v197_v20 = vld [vmem:[%s1215_s15 + $0xc0] sm:$0xff] }
  0x41   : > { %400 = vxpose.xlu2.b32.cont [4/16] %v190_v25, 128  ;;  %v259_v25 = vld [vmem:[%s1215_s15 + $0x2b0] sm:$0xff] }
  0x43   : > { %337 = vxpose.xlu0.b32.cont [5/16] %v193_v4, 128  ;;  %v177_v4 = vld [vmem:[%s1215_s15 + $0x20] sm:$0xff] }
  0x47   : > { %369 = vxpose.xlu1.b32.cont [5/16] %v194_v23, 128 }
  0x49   : > { %401 = vxpose.xlu2.b32.cont [5/16] %v195_v28, 128 }
  0x4b   : > { %338 = vxpose.xlu0.b32.cont [6/16] %v198_v5, 128  ;;  %v250_v5 = vld [vmem:[%s1215_s15 + $0x268] sm:$0xff] }
  0x4f   : > { %370 = vxpose.xlu1.b32.cont [6/16] %v199_v27, 128  ;;  %v273_v27 = vld [vmem:[%s1215_s15 + $0x320] sm:$0xff] }
  0x51   : > { %402 = vxpose.xlu2.b32.cont [6/16] %v200_v31, 128  ;;  %v264_v31 = vld [vmem:[%s1215_s15 + $0x2d8] sm:$0xff] }
  0x53   : > { %339 = vxpose.xlu0.b32.cont [7/16] %v203_v6, 128 }
  0x57   : > { %371 = vxpose.xlu1.b32.cont [7/16] %v204_v30, 128 }
  0x59   : > { %403 = vxpose.xlu2.b32.cont [7/16] %v205_v34, 128 }
  0x5b   : > { %340 = vxpose.xlu0.b32.cont [8/16] %v208_v7, 128  ;;  %v241_v7 = vld [vmem:[%s1215_s15 + $0x220] sm:$0xff] }
  0x5f   : > { %372 = vxpose.xlu1.b32.cont [8/16] %v209_v33, 128  ;;  %v278_v33 = vld [vmem:[%s1215_s15 + $0x348] sm:$0xff] }
  0x61   : > { %404 = vxpose.xlu2.b32.cont [8/16] %v210_v37, 128  ;;  %v269_v37 = vld [vmem:[%s1215_s15 + $0x300] sm:$0xff] }
  0x63   : > { %341 = vxpose.xlu0.b32.cont [9/16] %v213_v8, 128  ;;  %v182_v8 = vld [vmem:[%s1215_s15 + $0x48] sm:$0xff] }
  0x67   : > { %373 = vxpose.xlu1.b32.cont [9/16] %v214_v36, 128 }
  0x69   : > { %405 = vxpose.xlu2.b32.cont [9/16] %v215_v41, 128 }
  0x6b   : > { %342 = vxpose.xlu0.b32.cont [10/16] %v218_v9, 128  ;;  %v253_v9 = vld [vmem:[%s1215_s15 + $0x280] sm:$0xff] }
  0x6f   : > { %374 = vxpose.xlu1.b32.cont [10/16] %v219_v40, 128 }
  0x71   : > { %406 = vxpose.xlu2.b32.cont [10/16] %v220_v45, 128  ;;  %v288_v45 = vld [vmem:[%s1215_s15 + $0x398] sm:$0xff] }
  0x73   : > { %343 = vxpose.xlu0.b32.cont [11/16] %v223_v10, 128 }
  0x77   : > { %375 = vxpose.xlu1.b32.cont [11/16] %v224_v44, 128  ;;  %v217_v44 = vld [vmem:[%s1215_s15 + $0x160] sm:$0xff] }
  0x79   : > { %407 = vxpose.xlu2.b32.cont [11/16] %v225_v49, 128  ;;  %v279_v49 = vld [vmem:[%s1215_s15 + $0x350] sm:$0xff] }
  0x7b   : > { %344 = vxpose.xlu0.b32.cont [12/16] %v228_v11, 128  ;;  %v246_v11 = vld [vmem:[%s1215_s15 + $0x248] sm:$0xff] }
  0x7f   : > { %376 = vxpose.xlu1.b32.cont [12/16] %v229_v48, 128 }
  0x81   : > { %408 = vxpose.xlu2.b32.cont [12/16] %v230_v53, 128 }
  0x83   : > { %345 = vxpose.xlu0.b32.cont [13/16] %v233_v13, 128  ;;  %v258_v13 = vld [vmem:[%s1215_s15 + $0x2a8] sm:$0xff] }
  0x87   : > { %377 = vxpose.xlu1.b32.cont [13/16] %v234_v52, 128 }
  0x89   : > { %409 = vxpose.xlu2.b32.cont [13/16] %v235_v57, 128  ;;  %v298_v57 = vld [vmem:[%s1215_s15 + $0x3e8] sm:$0xff] }
  0x8b   : > { %346 = vxpose.xlu0.b32.cont [14/16] %v238_v15, 128  ;;  %v251_v15 = vld [vmem:[%s1215_s15 + $0x270] sm:$0xff] }
  0x8f   : > { %378 = vxpose.xlu1.b32.cont [14/16] %v239_v56, 128  ;;  %v227_v56 = vld [vmem:[%s1215_s15 + $0x1b0] sm:$0xff] }
  0x91   : > { %410 = vxpose.xlu2.b32.cont [14/16] %v240_v61, 128  ;;  %v289_v61 = vld [vmem:[%s1215_s15 + $0x3a0] sm:$0xff] }
  0x93   : > { %347 = vxpose.xlu0.b32.cont [15/16] %v243_v18, 128 }
  0x97   : > { %379 = vxpose.xlu1.b32.cont [15/16] %v244_v60, 128 }
  0x99   : > { %411 = vxpose.xlu2.b32.cont [15/16] %v245_v1, 128 }
  0x9b   : > { %348 = vxpose.xlu0.b32.end [16/16] %v248_v21, 128  ;;  %v268_v21 = vld [vmem:[%s1215_s15 + $0x2f8] sm:$0xff] }
  0x9f   : > { %380 = vxpose.xlu1.b32.end [16/16] %v249_v0, 128 }
  0xa1   : > { %412 = vxpose.xlu2.b32.end [16/16] %v250_v5, 128  ;;  %v308_v5 = vld [vmem:[%s1215_s15 + $0x438] sm:$0xff] }
  0xa3   : > { %429 = vxpose.xlu0.b32.start [1/16] %v176_v24, 128 }
  0xa7   : > { %461 = vxpose.xlu1.b32.start [1/16] %v177_v4, 128  ;;  %v237_v4 = vld [vmem:[%s1215_s15 + $0x200] sm:$0xff] }
  0xa9   : > { %493 = vxpose.xlu2.b32.start [1/16] %v253_v9, 128  ;;  %v299_v9 = vld [vmem:[%s1215_s15 + $0x3f0] sm:$0xff] }
  0xab   : > { %430 = vxpose.xlu0.b32.cont [2/16] %v181_v26, 128  ;;  %v202_v26 = vld [vmem:[%s1215_s15 + $0xe8] sm:$0xff] }
  0xaf   : > { %462 = vxpose.xlu1.b32.cont [2/16] %v182_v8, 128 }
  0xb1   : > { %494 = vxpose.xlu2.b32.cont [2/16] %v258_v13, 128 }
  0xb3   : > { %431 = vxpose.xlu0.b32.cont [3/16] %v186_v29, 128 }
  0xb7   : > { %463 = vxpose.xlu1.b32.cont [3/16] %v187_v12, 128 }
  0xb9   : > { %495 = vxpose.xlu2.b32.cont [3/16] %v263_v17, 128  ;;  %v318_v17 = vld [vmem:[%s1215_s15 + $0x488] sm:$0xff] }
  0xbb   : > { %432 = vxpose.xlu0.b32.cont [4/16] %v191_v32, 128  ;;  %v207_v32 = vld [vmem:[%s1215_s15 + $0x110] sm:$0xff] }
  0xbf   : > { %464 = vxpose.xlu1.b32.cont [4/16] %v192_v16, 128  ;;  %v247_v16 = vld [vmem:[%s1215_s15 + $0x250] sm:$0xff] }
  0xc1   : > { %496 = vxpose.xlu2.b32.cont [4/16] %v268_v21, 128  ;;  %v309_v21 = vld [vmem:[%s1215_s15 + $0x440] sm:$0xff] }
  0xc2   : > { %v413_v22 = vpop.trf.xlu2 }
  0xc3   : > { %433 = vxpose.xlu0.b32.cont [5/16] %v196_v35, 128  ;;  %717 = vst [vmem:[%s1261_s16 + $0x200] sm:$0xff] %v413_v22  ;;  %v252_v22 = vld [vmem:[%s1215_s15 + $0x278] sm:$0xff] }
  0xc7   : > { %v349_v38 = vpop.trf.xlu0  ;;  %465 = vxpose.xlu1.b32.cont [5/16] %v197_v20, 128 }
  0xc8   : > { %653 = vst [vmem:[%s1261_s16] sm:$0xff] %v349_v38  ;;  %v212_v38 = vld [vmem:[%s1215_s15 + $0x138] sm:$0xff] }
  0xc9   : > { %497 = vxpose.xlu2.b32.cont [5/16] %v273_v27, 128  ;;  %v314_v27 = vld [vmem:[%s1215_s15 + $0x468] sm:$0xff] }
  0xca   : > { %v414_v28 = vpop.trf.xlu2 }
  0xcb   : > { %434 = vxpose.xlu0.b32.cont [6/16] %v201_v39, 128  ;;  %v381_v23 = vpop.trf.xlu1  ;;  %719 = vst [vmem:[%s1261_s16 + $0x210] sm:$0xff] %v414_v28  ;;  %v283_v39 = vld [vmem:[%s1215_s15 + $0x370] sm:$0xff] }
  0xcc   : > { %685 = vst [vmem:[%s1261_s16 + $0x100] sm:$0xff] %v381_v23  ;;  %v323_v23 = vld [vmem:[%s1215_s15 + $0x4b0] sm:$0xff] }
  0xcd   : > { %v255_v28 = vld [vmem:[%s1215_s15 + $0x290] sm:$0xff] }
  0xcf   : > { %v350_v42 = vpop.trf.xlu0  ;;  %466 = vxpose.xlu1.b32.cont [6/16] %v202_v26, 128 }
  0xd0   : > { %655 = vst [vmem:[%s1261_s16 + $0x10] sm:$0xff] %v350_v42 }
  0xd1   : > { %498 = vxpose.xlu2.b32.cont [6/16] %v278_v33, 128  ;;  %v319_v33 = vld [vmem:[%s1215_s15 + $0x490] sm:$0xff] }
  0xd2   : > { %v415_v34 = vpop.trf.xlu2 }
  0xd3   : > { %435 = vxpose.xlu0.b32.cont [7/16] %v206_v43, 128  ;;  %v382_v29 = vpop.trf.xlu1  ;;  %721 = vst [vmem:[%s1261_s16 + $0x220] sm:$0xff] %v415_v34  ;;  %v274_v43 = vld [vmem:[%s1215_s15 + $0x328] sm:$0xff]  ;;  %v260_v34 = vld [vmem:[%s1215_s15 + $0x2b8] sm:$0xff] }
  0xd4   : > { %687 = vst [vmem:[%s1261_s16 + $0x110] sm:$0xff] %v382_v29  ;;  %v328_v29 = vld [vmem:[%s1215_s15 + $0x4d8] sm:$0xff] }
  0xd7   : > { %v351_v46 = vpop.trf.xlu0  ;;  %467 = vxpose.xlu1.b32.cont [7/16] %v207_v32, 128 }
  0xd8   : > { %657 = vst [vmem:[%s1261_s16 + $0x20] sm:$0xff] %v351_v46 }
  0xd9   : > { %499 = vxpose.xlu2.b32.cont [7/16] %v283_v39, 128  ;;  %v324_v39 = vld [vmem:[%s1215_s15 + $0x4b8] sm:$0xff] }
  0xda   : > { %v416_v40 = vpop.trf.xlu2 }
  0xdb   : > { %436 = vxpose.xlu0.b32.cont [8/16] %v211_v47, 128  ;;  %v383_v35 = vpop.trf.xlu1  ;;  %723 = vst [vmem:[%s1261_s16 + $0x230] sm:$0xff] %v416_v40  ;;  %v265_v40 = vld [vmem:[%s1215_s15 + $0x2e0] sm:$0xff] }
  0xdc   : > { %689 = vst [vmem:[%s1261_s16 + $0x120] sm:$0xff] %v383_v35  ;;  %v256_v35 = vld [vmem:[%s1215_s15 + $0x298] sm:$0xff] }
  0xdf   : > { %v352_v50 = vpop.trf.xlu0  ;;  %468 = vxpose.xlu1.b32.cont [8/16] %v212_v38, 128 }
  0xe0   : > { %659 = vst [vmem:[%s1261_s16 + $0x30] sm:$0xff] %v352_v50  ;;  %v222_v50 = vld [vmem:[%s1215_s15 + $0x188] sm:$0xff] }
  0xe1   : > { %500 = vxpose.xlu2.b32.cont [8/16] %v288_v45, 128  ;;  %v329_v45 = vld [vmem:[%s1215_s15 + $0x4e0] sm:$0xff] }
  0xe2   : > { %v417_v46 = vpop.trf.xlu2 }
  0xe3   : > { %437 = vxpose.xlu0.b32.cont [9/16] %v216_v51, 128  ;;  %v384_v41 = vpop.trf.xlu1  ;;  %725 = vst [vmem:[%s1261_s16 + $0x240] sm:$0xff] %v417_v46  ;;  %v293_v51 = vld [vmem:[%s1215_s15 + $0x3c0] sm:$0xff]  ;;  %v270_v46 = vld [vmem:[%s1215_s15 + $0x308] sm:$0xff] }
  0xe4   : > { %691 = vst [vmem:[%s1261_s16 + $0x130] sm:$0xff] %v384_v41  ;;  %v261_v41 = vld [vmem:[%s1215_s15 + $0x2c0] sm:$0xff] }
  0xe7   : > { %v353_v54 = vpop.trf.xlu0  ;;  %469 = vxpose.xlu1.b32.cont [9/16] %v217_v44, 128 }
  0xe8   : > { %661 = vst [vmem:[%s1261_s16 + $0x40] sm:$0xff] %v353_v54 }
  0xe9   : > { %501 = vxpose.xlu2.b32.cont [9/16] %v293_v51, 128  ;;  %v257_v51 = vld [vmem:[%s1215_s15 + $0x2a0] sm:$0xff] }
  0xea   : > { %v418_v52 = vpop.trf.xlu2 }
  0xeb   : > { %438 = vxpose.xlu0.b32.cont [10/16] %v221_v55, 128  ;;  %v385_v47 = vpop.trf.xlu1  ;;  %727 = vst [vmem:[%s1261_s16 + $0x250] sm:$0xff] %v418_v52  ;;  %v284_v55 = vld [vmem:[%s1215_s15 + $0x378] sm:$0xff]  ;;  %v275_v52 = vld [vmem:[%s1215_s15 + $0x330] sm:$0xff] }
  0xec   : > { %693 = vst [vmem:[%s1261_s16 + $0x140] sm:$0xff] %v385_v47  ;;  %v266_v47 = vld [vmem:[%s1215_s15 + $0x2e8] sm:$0xff] }
  0xef   : > { %v354_v58 = vpop.trf.xlu0  ;;  %470 = vxpose.xlu1.b32.cont [10/16] %v222_v50, 128 }
  0xf0   : > { %663 = vst [vmem:[%s1261_s16 + $0x50] sm:$0xff] %v354_v58 }
  0xf1   : > { %502 = vxpose.xlu2.b32.cont [10/16] %v298_v57, 128  ;;  %v262_v57 = vld [vmem:[%s1215_s15 + $0x2c8] sm:$0xff] }
  0xf2   : > { %v419_v58 = vpop.trf.xlu2 }
  0xf3   : > { %439 = vxpose.xlu0.b32.cont [11/16] %v226_v59, 128  ;;  %v386_v53 = vpop.trf.xlu1  ;;  %729 = vst [vmem:[%s1261_s16 + $0x260] sm:$0xff] %v419_v58  ;;  %v280_v58 = vld [vmem:[%s1215_s15 + $0x358] sm:$0xff] }
  0xf4   : > { %695 = vst [vmem:[%s1261_s16 + $0x150] sm:$0xff] %v386_v53  ;;  %v271_v53 = vld [vmem:[%s1215_s15 + $0x310] sm:$0xff] }
  0xf7   : > { %v355_v62 = vpop.trf.xlu0  ;;  %471 = vxpose.xlu1.b32.cont [11/16] %v227_v56, 128 }
  0xf8   : > { %665 = vst [vmem:[%s1261_s16 + $0x60] sm:$0xff] %v355_v62  ;;  %v232_v62 = vld [vmem:[%s1215_s15 + $0x1d8] sm:$0xff] }
  0xfa   : > { %v420_v0 = vpop.trf.xlu2 }
  0xfb   : > { %440 = vxpose.xlu0.b32.cont [12/16] %v231_v63, 128  ;;  %v387_v59 = vpop.trf.xlu1  ;;  %v303_v63 = vld [vmem:[%s1215_s15 + $0x410] sm:$0xff]  ;;  %731 = vst [vmem:[%s1261_s16 + $0x270] sm:$0xff] %v420_v0  ;;  %v285_v0 = vld [vmem:[%s1215_s15 + $0x380] sm:$0xff] }
  0xfc   : > { %697 = vst [vmem:[%s1261_s16 + $0x160] sm:$0xff] %v387_v59  ;;  %503 = vxpose.xlu2.b32.cont [11/16] %v303_v63, 128  ;;  %v276_v59 = vld [vmem:[%s1215_s15 + $0x338] sm:$0xff]  ;;  %v267_v63 = vld [vmem:[%s1215_s15 + $0x2f0] sm:$0xff] }
  0xff   : > { %v356_v2 = vpop.trf.xlu0  ;;  %472 = vxpose.xlu1.b32.cont [12/16] %v232_v62, 128 }
 0x100   : > { %667 = vst [vmem:[%s1261_s16 + $0x70] sm:$0xff] %v356_v2 }
 0x103   : > { %441 = vxpose.xlu0.b32.cont [13/16] %v236_v3, 128  ;;  %v388_v1 = vpop.trf.xlu1  ;;  %v294_v3 = vld [vmem:[%s1215_s15 + $0x3c8] sm:$0xff] }
 0x104   : > { %699 = vst [vmem:[%s1261_s16 + $0x170] sm:$0xff] %v388_v1  ;;  %504 = vxpose.xlu2.b32.cont [12/16] %v308_v5, 128  ;;  %v281_v1 = vld [vmem:[%s1215_s15 + $0x360] sm:$0xff]  ;;  %v272_v5 = vld [vmem:[%s1215_s15 + $0x318] sm:$0xff] }
 0x107   : > { %v357_v6 = vpop.trf.xlu0  ;;  %473 = vxpose.xlu1.b32.cont [13/16] %v237_v4, 128 }
 0x108   : > { %669 = vst [vmem:[%s1261_s16 + $0x80] sm:$0xff] %v357_v6  ;;  %v421_v6 = vpop.trf.xlu2 }
 0x109   : > { %733 = vst [vmem:[%s1261_s16 + $0x280] sm:$0xff] %v421_v6  ;;  %v290_v6 = vld [vmem:[%s1215_s15 + $0x3a8] sm:$0xff] }
 0x10b   : > { %442 = vxpose.xlu0.b32.cont [14/16] %v241_v7, 128  ;;  %v389_v7 = vpop.trf.xlu1 }
 0x10c   : > { %701 = vst [vmem:[%s1261_s16 + $0x180] sm:$0xff] %v389_v7  ;;  %v286_v7 = vld [vmem:[%s1215_s15 + $0x388] sm:$0xff] }
 0x10f   : > { %v358_v10 = vpop.trf.xlu0 }
 0x110   : > { %671 = vst [vmem:[%s1261_s16 + $0x90] sm:$0xff] %v358_v10  ;;  %v242_v10 = vld [vmem:[%s1215_s15 + $0x228] sm:$0xff]  ;;  %v422_v12 = vpop.trf.xlu2 }
 0x111   : > { %474 = vxpose.xlu1.b32.cont [14/16] %v242_v10, 128  ;;  %735 = vst [vmem:[%s1261_s16 + $0x290] sm:$0xff] %v422_v12  ;;  %v295_v12 = vld [vmem:[%s1215_s15 + $0x3d0] sm:$0xff] }
 0x113   : > { %443 = vxpose.xlu0.b32.cont [15/16] %v246_v11, 128  ;;  %v313_v11 = vld [vmem:[%s1215_s15 + $0x460] sm:$0xff]  ;;  %v390_v13 = vpop.trf.xlu1 }
 0x114   : > { %505 = vxpose.xlu2.b32.cont [13/16] %v313_v11, 128  ;;  %703 = vst [vmem:[%s1261_s16 + $0x190] sm:$0xff] %v390_v13  ;;  %v277_v11 = vld [vmem:[%s1215_s15 + $0x340] sm:$0xff]  ;;  %v291_v13 = vld [vmem:[%s1215_s15 + $0x3b0] sm:$0xff] }
 0x117   : > { %v359_v14 = vpop.trf.xlu0 }
 0x118   : > { %673 = vst [vmem:[%s1261_s16 + $0xa0] sm:$0xff] %v359_v14 }
 0x119   : > { %475 = vxpose.xlu1.b32.cont [15/16] %v247_v16, 128 }
 0x11b   : > { %444 = vxpose.xlu0.b32.end [16/16] %v251_v15, 128  ;;  %v304_v15 = vld [vmem:[%s1215_s15 + $0x418] sm:$0xff] }
 0x11c   : > { %506 = vxpose.xlu2.b32.cont [14/16] %v318_v17, 128  ;;  %v282_v17 = vld [vmem:[%s1215_s15 + $0x368] sm:$0xff] }
 0x11f   : > { %v360_v18 = vpop.trf.xlu0 }
 0x120   : > { %675 = vst [vmem:[%s1261_s16 + $0xb0] sm:$0xff] %v360_v18  ;;  %v423_v18 = vpop.trf.xlu2 }
 0x121   : > { %737 = vst [vmem:[%s1261_s16 + $0x2a0] sm:$0xff] %v423_v18  ;;  %476 = vxpose.xlu1.b32.end [16/16] %v252_v22, 128  ;;  %v300_v18 = vld [vmem:[%s1215_s15 + $0x3f8] sm:$0xff] }
 0x123   : > { %525 = vxpose.xlu0.b32.start [1/16] %v254_v19, 128  ;;  %v391_v19 = vpop.trf.xlu1 }
 0x124   : > { %705 = vst [vmem:[%s1261_s16 + $0x1a0] sm:$0xff] %v391_v19  ;;  %507 = vxpose.xlu2.b32.cont [15/16] %v323_v23, 128  ;;  %v296_v19 = vld [vmem:[%s1215_s15 + $0x3d8] sm:$0xff]  ;;  %v287_v23 = vld [vmem:[%s1215_s15 + $0x390] sm:$0xff] }
 0x127   : > { %v361_v24 = vpop.trf.xlu0 }
 0x128   : > { %677 = vst [vmem:[%s1261_s16 + $0xc0] sm:$0xff] %v361_v24  ;;  %v424_v24 = vpop.trf.xlu2 }
 0x129   : > { %739 = vst [vmem:[%s1261_s16 + $0x2b0] sm:$0xff] %v424_v24  ;;  %557 = vxpose.xlu1.b32.start [1/16] %v255_v28, 128  ;;  %v305_v24 = vld [vmem:[%s1215_s15 + $0x420] sm:$0xff] }
 0x12b   : > { %526 = vxpose.xlu0.b32.cont [2/16] %v259_v25, 128  ;;  %v392_v25 = vpop.trf.xlu1 }
 0x12c   : > { %707 = vst [vmem:[%s1261_s16 + $0x1b0] sm:$0xff] %v392_v25  ;;  %508 = vxpose.xlu2.b32.end [16/16] %v328_v29, 128  ;;  %v301_v25 = vld [vmem:[%s1215_s15 + $0x400] sm:$0xff]  ;;  %v292_v29 = vld [vmem:[%s1215_s15 + $0x3b8] sm:$0xff] }
 0x12f   : > { %v362_v30 = vpop.trf.xlu0 }
 0x130   : > { %679 = vst [vmem:[%s1261_s16 + $0xd0] sm:$0xff] %v362_v30  ;;  %v425_v30 = vpop.trf.xlu2 }
 0x131   : > { %741 = vst [vmem:[%s1261_s16 + $0x2c0] sm:$0xff] %v425_v30  ;;  %558 = vxpose.xlu1.b32.cont [2/16] %v260_v34, 128  ;;  %v310_v30 = vld [vmem:[%s1215_s15 + $0x448] sm:$0xff] }
 0x133   : > { %527 = vxpose.xlu0.b32.cont [3/16] %v264_v31, 128  ;;  %v393_v31 = vpop.trf.xlu1 }
 0x134   : > { %709 = vst [vmem:[%s1261_s16 + $0x1c0] sm:$0xff] %v393_v31  ;;  %589 = vxpose.xlu2.b32.start [1/16] %v256_v35, 128  ;;  %v306_v31 = vld [vmem:[%s1215_s15 + $0x428] sm:$0xff]  ;;  %v297_v35 = vld [vmem:[%s1215_s15 + $0x3e0] sm:$0xff] }
 0x137   : > { %v363_v36 = vpop.trf.xlu0 }
 0x138   : > { %681 = vst [vmem:[%s1261_s16 + $0xe0] sm:$0xff] %v363_v36  ;;  %v426_v36 = vpop.trf.xlu2 }
 0x139   : > { %743 = vst [vmem:[%s1261_s16 + $0x2d0] sm:$0xff] %v426_v36  ;;  %559 = vxpose.xlu1.b32.cont [3/16] %v265_v40, 128  ;;  %v315_v36 = vld [vmem:[%s1215_s15 + $0x470] sm:$0xff] }
 0x13b   : > { %528 = vxpose.xlu0.b32.cont [4/16] %v269_v37, 128  ;;  %v394_v37 = vpop.trf.xlu1 }
 0x13c   : > { %711 = vst [vmem:[%s1261_s16 + $0x1d0] sm:$0xff] %v394_v37  ;;  %590 = vxpose.xlu2.b32.cont [2/16] %v261_v41, 128  ;;  %v311_v37 = vld [vmem:[%s1215_s15 + $0x450] sm:$0xff]  ;;  %v302_v41 = vld [vmem:[%s1215_s15 + $0x408] sm:$0xff] }
 0x13f   : > { %v364_v42 = vpop.trf.xlu0 }
 0x140   : > { %683 = vst [vmem:[%s1261_s16 + $0xf0] sm:$0xff] %v364_v42  ;;  %v427_v42 = vpop.trf.xlu2 }
 0x141   : > { %745 = vst [vmem:[%s1261_s16 + $0x2e0] sm:$0xff] %v427_v42  ;;  %560 = vxpose.xlu1.b32.cont [4/16] %v270_v46, 128  ;;  %v320_v42 = vld [vmem:[%s1215_s15 + $0x498] sm:$0xff] }
 0x143   : > { %529 = vxpose.xlu0.b32.cont [5/16] %v274_v43, 128  ;;  %v395_v43 = vpop.trf.xlu1 }
 0x144   : > { %713 = vst [vmem:[%s1261_s16 + $0x1e0] sm:$0xff] %v395_v43  ;;  %591 = vxpose.xlu2.b32.cont [3/16] %v266_v47, 128  ;;  %v316_v43 = vld [vmem:[%s1215_s15 + $0x478] sm:$0xff]  ;;  %v307_v47 = vld [vmem:[%s1215_s15 + $0x430] sm:$0xff] }
 0x147   : > { %v445_v48 = vpop.trf.xlu0 }
 0x148   : > { %749 = vst [vmem:[%s1261_s16 + $0x300] sm:$0xff] %v445_v48  ;;  %v428_v48 = vpop.trf.xlu2 }
 0x149   : > { %747 = vst [vmem:[%s1261_s16 + $0x2f0] sm:$0xff] %v428_v48  ;;  %561 = vxpose.xlu1.b32.cont [5/16] %v275_v52, 128  ;;  %v325_v48 = vld [vmem:[%s1215_s15 + $0x4c0] sm:$0xff] }
 0x14b   : > { %530 = vxpose.xlu0.b32.cont [6/16] %v279_v49, 128  ;;  %v396_v49 = vpop.trf.xlu1 }
 0x14c   : > { %715 = vst [vmem:[%s1261_s16 + $0x1f0] sm:$0xff] %v396_v49  ;;  %592 = vxpose.xlu2.b32.cont [4/16] %v271_v53, 128  ;;  %v321_v49 = vld [vmem:[%s1215_s15 + $0x4a0] sm:$0xff]  ;;  %v312_v53 = vld [vmem:[%s1215_s15 + $0x458] sm:$0xff] }
 0x14f   : > { %v446_v54 = vpop.trf.xlu0 }
 0x150   : > { %751 = vst [vmem:[%s1261_s16 + $0x310] sm:$0xff] %v446_v54  ;;  %v509_v54 = vpop.trf.xlu2 }
 0x151   : > { %654 = vst [vmem:[%s1261_s16 + $0x8] sm:$0xff] %v509_v54  ;;  %562 = vxpose.xlu1.b32.cont [6/16] %v280_v58, 128  ;;  %v330_v54 = vld [vmem:[%s1215_s15 + $0x4e8] sm:$0xff] }
 0x153   : > { %531 = vxpose.xlu0.b32.cont [7/16] %v284_v55, 128  ;;  %v477_v55 = vpop.trf.xlu1 }
 0x154   : > { %781 = vst [vmem:[%s1261_s16 + $0x400] sm:$0xff] %v477_v55  ;;  %593 = vxpose.xlu2.b32.cont [5/16] %v276_v59, 128  ;;  %v326_v55 = vld [vmem:[%s1215_s15 + $0x4c8] sm:$0xff]  ;;  %v317_v59 = vld [vmem:[%s1215_s15 + $0x480] sm:$0xff] }
 0x157   : > { %v447_v60 = vpop.trf.xlu0 }
 0x158   : > { %753 = vst [vmem:[%s1261_s16 + $0x320] sm:$0xff] %v447_v60  ;;  %v510_v60 = vpop.trf.xlu2 }
 0x159   : > { %656 = vst [vmem:[%s1261_s16 + $0x18] sm:$0xff] %v510_v60  ;;  %563 = vxpose.xlu1.b32.cont [7/16] %v285_v0, 128  ;;  %v331_v60 = vld [vmem:[%s1215_s15 + $0x4f0] sm:$0xff]  ;;  %v322_v0 = vld [vmem:[%s1215_s15 + $0x4a8] sm:$0xff] }
 0x15b   : > { %532 = vxpose.xlu0.b32.cont [8/16] %v289_v61, 128  ;;  %v478_v61 = vpop.trf.xlu1 }
 0x15c   : > { %783 = vst [vmem:[%s1261_s16 + $0x410] sm:$0xff] %v478_v61  ;;  %594 = vxpose.xlu2.b32.cont [6/16] %v281_v1, 128 }
 0x15f   : > { %v448_v2 = vpop.trf.xlu0 }
 0x160   : > { %755 = vst [vmem:[%s1261_s16 + $0x330] sm:$0xff] %v448_v2  ;;  %v511_v2 = vpop.trf.xlu2 }
 0x161   : > { %658 = vst [vmem:[%s1261_s16 + $0x28] sm:$0xff] %v511_v2  ;;  %564 = vxpose.xlu1.b32.cont [8/16] %v290_v6, 128 }
 0x163   : > { %533 = vxpose.xlu0.b32.cont [9/16] %v294_v3, 128  ;;  %v479_v3 = vpop.trf.xlu1 }
 0x164   : > { %785 = vst [vmem:[%s1261_s16 + $0x420] sm:$0xff] %v479_v3  ;;  %595 = vxpose.xlu2.b32.cont [7/16] %v286_v7, 128 }
 0x167   : > { %v449_v8 = vpop.trf.xlu0 }
 0x168   : > { %757 = vst [vmem:[%s1261_s16 + $0x340] sm:$0xff] %v449_v8  ;;  %v512_v8 = vpop.trf.xlu2 }
 0x169   : > { %660 = vst [vmem:[%s1261_s16 + $0x38] sm:$0xff] %v512_v8  ;;  %565 = vxpose.xlu1.b32.cont [9/16] %v295_v12, 128  ;;  %v332_v8 = vld [vmem:[%s1215_s15 + $0x4f8] sm:$0xff] }
 0x16b   : > { %534 = vxpose.xlu0.b32.cont [10/16] %v299_v9, 128  ;;  %v480_v9 = vpop.trf.xlu1 }
 0x16c   : > { %787 = vst [vmem:[%s1261_s16 + $0x430] sm:$0xff] %v480_v9  ;;  %596 = vxpose.xlu2.b32.cont [8/16] %v291_v13, 128 }
 0x16f   : > { %v450_v14 = vpop.trf.xlu0 }
 0x170   : > { %759 = vst [vmem:[%s1261_s16 + $0x350] sm:$0xff] %v450_v14  ;;  %v513_v14 = vpop.trf.xlu2 }
 0x171   : > { %662 = vst [vmem:[%s1261_s16 + $0x48] sm:$0xff] %v513_v14  ;;  %566 = vxpose.xlu1.b32.cont [10/16] %v300_v18, 128 }
 0x173   : > { %535 = vxpose.xlu0.b32.cont [11/16] %v304_v15, 128  ;;  %v481_v15 = vpop.trf.xlu1 }
 0x174   : > { %789 = vst [vmem:[%s1261_s16 + $0x440] sm:$0xff] %v481_v15  ;;  %597 = vxpose.xlu2.b32.cont [9/16] %v296_v19, 128 }
 0x177   : > { %v451_v20 = vpop.trf.xlu0 }
 0x178   : > { %761 = vst [vmem:[%s1261_s16 + $0x360] sm:$0xff] %v451_v20  ;;  %v514_v20 = vpop.trf.xlu2 }
 0x179   : > { %664 = vst [vmem:[%s1261_s16 + $0x58] sm:$0xff] %v514_v20  ;;  %567 = vxpose.xlu1.b32.cont [11/16] %v305_v24, 128 }
 0x17b   : > { %536 = vxpose.xlu0.b32.cont [12/16] %v309_v21, 128  ;;  %v482_v21 = vpop.trf.xlu1 }
 0x17c   : > { %791 = vst [vmem:[%s1261_s16 + $0x450] sm:$0xff] %v482_v21  ;;  %598 = vxpose.xlu2.b32.cont [10/16] %v301_v25, 128 }
 0x17f   : > { %v452_v26 = vpop.trf.xlu0 }
 0x180   : > { %763 = vst [vmem:[%s1261_s16 + $0x370] sm:$0xff] %v452_v26  ;;  %v515_v26 = vpop.trf.xlu2 }
 0x181   : > { %666 = vst [vmem:[%s1261_s16 + $0x68] sm:$0xff] %v515_v26  ;;  %568 = vxpose.xlu1.b32.cont [12/16] %v310_v30, 128 }
 0x183   : > { %537 = vxpose.xlu0.b32.cont [13/16] %v314_v27, 128  ;;  %v483_v27 = vpop.trf.xlu1 }
 0x184   : > { %793 = vst [vmem:[%s1261_s16 + $0x460] sm:$0xff] %v483_v27  ;;  %599 = vxpose.xlu2.b32.cont [11/16] %v306_v31, 128 }
 0x187   : > { %v453_v32 = vpop.trf.xlu0 }
 0x188   : > { %765 = vst [vmem:[%s1261_s16 + $0x380] sm:$0xff] %v453_v32  ;;  %v516_v32 = vpop.trf.xlu2 }
 0x189   : > { %668 = vst [vmem:[%s1261_s16 + $0x78] sm:$0xff] %v516_v32  ;;  %569 = vxpose.xlu1.b32.cont [13/16] %v315_v36, 128 }
 0x18b   : > { %538 = vxpose.xlu0.b32.cont [14/16] %v319_v33, 128  ;;  %v484_v33 = vpop.trf.xlu1 }
 0x18c   : > { %795 = vst [vmem:[%s1261_s16 + $0x470] sm:$0xff] %v484_v33  ;;  %600 = vxpose.xlu2.b32.cont [12/16] %v311_v37, 128 }
 0x18f   : > { %v454_v38 = vpop.trf.xlu0 }
 0x190   : > { %767 = vst [vmem:[%s1261_s16 + $0x390] sm:$0xff] %v454_v38  ;;  %v517_v38 = vpop.trf.xlu2 }
 0x191   : > { %670 = vst [vmem:[%s1261_s16 + $0x88] sm:$0xff] %v517_v38  ;;  %570 = vxpose.xlu1.b32.cont [14/16] %v320_v42, 128 }
 0x193   : > { %539 = vxpose.xlu0.b32.cont [15/16] %v324_v39, 128  ;;  %v485_v39 = vpop.trf.xlu1 }
 0x194   : > { %797 = vst [vmem:[%s1261_s16 + $0x480] sm:$0xff] %v485_v39  ;;  %601 = vxpose.xlu2.b32.cont [13/16] %v316_v43, 128 }
 0x197   : > { %v455_v44 = vpop.trf.xlu0 }
 0x198   : > { %769 = vst [vmem:[%s1261_s16 + $0x3a0] sm:$0xff] %v455_v44  ;;  %v518_v44 = vpop.trf.xlu2 }
 0x199   : > { %672 = vst [vmem:[%s1261_s16 + $0x98] sm:$0xff] %v518_v44  ;;  %571 = vxpose.xlu1.b32.cont [15/16] %v325_v48, 128 }
 0x19b   : > { %540 = vxpose.xlu0.b32.end [16/16] %v329_v45, 128  ;;  %v486_v45 = vpop.trf.xlu1 }
 0x19c   : > { %799 = vst [vmem:[%s1261_s16 + $0x490] sm:$0xff] %v486_v45  ;;  %602 = vxpose.xlu2.b32.cont [14/16] %v321_v49, 128 }
 0x19f   : > { %v456_v50 = vpop.trf.xlu0 }
 0x1a0   : > { %771 = vst [vmem:[%s1261_s16 + $0x3b0] sm:$0xff] %v456_v50  ;;  %v519_v50 = vpop.trf.xlu2 }
 0x1a1   : > { %674 = vst [vmem:[%s1261_s16 + $0xa8] sm:$0xff] %v519_v50  ;;  %572 = vxpose.xlu1.b32.end [16/16] %v330_v54, 128 }
 0x1a3   : > { %621 = vxpose.xlu0.b32.start [1/16] %v257_v51, 128  ;;  %v487_v51 = vpop.trf.xlu1 }
 0x1a4   : > { %801 = vst [vmem:[%s1261_s16 + $0x4a0] sm:$0xff] %v487_v51  ;;  %603 = vxpose.xlu2.b32.cont [15/16] %v326_v55, 128 }
 0x1a7   : > { %v457_v56 = vpop.trf.xlu0 }
 0x1a8   : > { %773 = vst [vmem:[%s1261_s16 + $0x3c0] sm:$0xff] %v457_v56  ;;  %v520_v56 = vpop.trf.xlu2 }
 0x1a9   : > { %676 = vst [vmem:[%s1261_s16 + $0xb8] sm:$0xff] %v520_v56 }
 0x1ab   : > { %622 = vxpose.xlu0.b32.cont [2/16] %v262_v57, 128  ;;  %v488_v57 = vpop.trf.xlu1 }
 0x1ac   : > { %803 = vst [vmem:[%s1261_s16 + $0x4b0] sm:$0xff] %v488_v57  ;;  %604 = vxpose.xlu2.b32.end [16/16] %v331_v60, 128 }
 0x1af   : > { %v458_v62 = vpop.trf.xlu0 }
 0x1b0   : > { %775 = vst [vmem:[%s1261_s16 + $0x3d0] sm:$0xff] %v458_v62  ;;  %v521_v61 = vpop.trf.xlu2 }
 0x1b1   : > { %678 = vst [vmem:[%s1261_s16 + $0xc8] sm:$0xff] %v521_v61 }
 0x1b3   : > { %623 = vxpose.xlu0.b32.cont [3/16] %v267_v63, 128  ;;  %v489_v62 = vpop.trf.xlu1 }
 0x1b4   : > { %805 = vst [vmem:[%s1261_s16 + $0x4c0] sm:$0xff] %v489_v62 }
 0x1b7   : > { %v459_v4 = vpop.trf.xlu0 }
 0x1b8   : > { %777 = vst [vmem:[%s1261_s16 + $0x3e0] sm:$0xff] %v459_v4  ;;  %v522_v1 = vpop.trf.xlu2  ;;  %v327_v4 = vld [vmem:[%s1215_s15 + $0x4d0] sm:$0xff] }
 0x1b9   : > { %680 = vst [vmem:[%s1261_s16 + $0xd8] sm:$0xff] %v522_v1 }
 0x1bb   : > { %624 = vxpose.xlu0.b32.cont [4/16] %v272_v5, 128  ;;  %v490_v2 = vpop.trf.xlu1 }
 0x1bc   : > { %807 = vst [vmem:[%s1261_s16 + $0x4d0] sm:$0xff] %v490_v2 }
 0x1bf   : > { %v460_v10 = vpop.trf.xlu0 }
 0x1c0   : > { %779 = vst [vmem:[%s1261_s16 + $0x3f0] sm:$0xff] %v460_v10  ;;  %v523_v5 = vpop.trf.xlu2 }
 0x1c1   : > { %682 = vst [vmem:[%s1261_s16 + $0xe8] sm:$0xff] %v523_v5 }
 0x1c3   : > { %625 = vxpose.xlu0.b32.cont [5/16] %v277_v11, 128  ;;  %v491_v6 = vpop.trf.xlu1 }
 0x1c4   : > { %809 = vst [vmem:[%s1261_s16 + $0x4e0] sm:$0xff] %v491_v6 }
 0x1c7   : > { %v541_v16 = vpop.trf.xlu0 }
 0x1c8   : > { %686 = vst [vmem:[%s1261_s16 + $0x108] sm:$0xff] %v541_v16  ;;  %v524_v9 = vpop.trf.xlu2 }
 0x1c9   : > { %684 = vst [vmem:[%s1261_s16 + $0xf8] sm:$0xff] %v524_v9 }
 0x1cb   : > { %626 = vxpose.xlu0.b32.cont [6/16] %v282_v17, 128  ;;  %v492_v10 = vpop.trf.xlu1 }
 0x1cc   : > { %811 = vst [vmem:[%s1261_s16 + $0x4f0] sm:$0xff] %v492_v10 }
 0x1cf   : > { %v542_v22 = vpop.trf.xlu0 }
 0x1d0   : > { %688 = vst [vmem:[%s1261_s16 + $0x118] sm:$0xff] %v542_v22  ;;  %v605_v12 = vpop.trf.xlu2 }
 0x1d1   : > { %750 = vst [vmem:[%s1261_s16 + $0x308] sm:$0xff] %v605_v12 }
 0x1d3   : > { %627 = vxpose.xlu0.b32.cont [7/16] %v287_v23, 128  ;;  %v573_v13 = vpop.trf.xlu1 }
 0x1d4   : > { %718 = vst [vmem:[%s1261_s16 + $0x208] sm:$0xff] %v573_v13 }
 0x1d7   : > { %v543_v28 = vpop.trf.xlu0 }
 0x1d8   : > { %690 = vst [vmem:[%s1261_s16 + $0x128] sm:$0xff] %v543_v28  ;;  %v606_v15 = vpop.trf.xlu2 }
 0x1d9   : > { %752 = vst [vmem:[%s1261_s16 + $0x318] sm:$0xff] %v606_v15 }
 0x1db   : > { %628 = vxpose.xlu0.b32.cont [8/16] %v292_v29, 128  ;;  %v574_v16 = vpop.trf.xlu1 }
 0x1dc   : > { %720 = vst [vmem:[%s1261_s16 + $0x218] sm:$0xff] %v574_v16 }
 0x1df   : > { %v544_v34 = vpop.trf.xlu0 }
 0x1e0   : > { %692 = vst [vmem:[%s1261_s16 + $0x138] sm:$0xff] %v544_v34  ;;  %v607_v18 = vpop.trf.xlu2 }
 0x1e1   : > { %754 = vst [vmem:[%s1261_s16 + $0x328] sm:$0xff] %v607_v18 }
 0x1e3   : > { %629 = vxpose.xlu0.b32.cont [9/16] %v297_v35, 128  ;;  %v575_v19 = vpop.trf.xlu1 }
 0x1e4   : > { %722 = vst [vmem:[%s1261_s16 + $0x228] sm:$0xff] %v575_v19 }
 0x1e7   : > { %v545_v40 = vpop.trf.xlu0 }
 0x1e8   : > { %694 = vst [vmem:[%s1261_s16 + $0x148] sm:$0xff] %v545_v40  ;;  %v608_v21 = vpop.trf.xlu2 }
 0x1e9   : > { %756 = vst [vmem:[%s1261_s16 + $0x338] sm:$0xff] %v608_v21 }
 0x1eb   : > { %630 = vxpose.xlu0.b32.cont [10/16] %v302_v41, 128  ;;  %v576_v22 = vpop.trf.xlu1 }
 0x1ec   : > { %724 = vst [vmem:[%s1261_s16 + $0x238] sm:$0xff] %v576_v22 }
 0x1ef   : > { %v546_v46 = vpop.trf.xlu0 }
 0x1f0   : > { %696 = vst [vmem:[%s1261_s16 + $0x158] sm:$0xff] %v546_v46  ;;  %v609_v24 = vpop.trf.xlu2 }
 0x1f1   : > { %758 = vst [vmem:[%s1261_s16 + $0x348] sm:$0xff] %v609_v24 }
 0x1f3   : > { %631 = vxpose.xlu0.b32.cont [11/16] %v307_v47, 128  ;;  %v577_v25 = vpop.trf.xlu1 }
 0x1f4   : > { %726 = vst [vmem:[%s1261_s16 + $0x248] sm:$0xff] %v577_v25 }
 0x1f7   : > { %v547_v52 = vpop.trf.xlu0 }
 0x1f8   : > { %698 = vst [vmem:[%s1261_s16 + $0x168] sm:$0xff] %v547_v52  ;;  %v610_v27 = vpop.trf.xlu2 }
 0x1f9   : > { %760 = vst [vmem:[%s1261_s16 + $0x358] sm:$0xff] %v610_v27 }
 0x1fb   : > { %632 = vxpose.xlu0.b32.cont [12/16] %v312_v53, 128  ;;  %v578_v28 = vpop.trf.xlu1 }
 0x1fc   : > { %728 = vst [vmem:[%s1261_s16 + $0x258] sm:$0xff] %v578_v28 }
 0x1ff   : > { %v548_v58 = vpop.trf.xlu0 }
 0x200   : > { %700 = vst [vmem:[%s1261_s16 + $0x178] sm:$0xff] %v548_v58  ;;  %v611_v30 = vpop.trf.xlu2 }
 0x201   : > { %762 = vst [vmem:[%s1261_s16 + $0x368] sm:$0xff] %v611_v30 }
 0x203   : > { %633 = vxpose.xlu0.b32.cont [13/16] %v317_v59, 128  ;;  %v579_v31 = vpop.trf.xlu1 }
 0x204   : > { %730 = vst [vmem:[%s1261_s16 + $0x268] sm:$0xff] %v579_v31 }
 0x207   : > { %v549_v63 = vpop.trf.xlu0 }
 0x208   : > { %702 = vst [vmem:[%s1261_s16 + $0x188] sm:$0xff] %v549_v63  ;;  %v612_v33 = vpop.trf.xlu2 }
 0x209   : > { %764 = vst [vmem:[%s1261_s16 + $0x378] sm:$0xff] %v612_v33 }
 0x20b   : > { %634 = vxpose.xlu0.b32.cont [14/16] %v322_v0, 128  ;;  %v580_v34 = vpop.trf.xlu1 }
 0x20c   : > { %732 = vst [vmem:[%s1261_s16 + $0x278] sm:$0xff] %v580_v34 }
 0x20f   : > { %v550_v3 = vpop.trf.xlu0 }
 0x210   : > { %704 = vst [vmem:[%s1261_s16 + $0x198] sm:$0xff] %v550_v3  ;;  %v613_v36 = vpop.trf.xlu2 }
 0x211   : > { %766 = vst [vmem:[%s1261_s16 + $0x388] sm:$0xff] %v613_v36 }
 0x213   : > { %635 = vxpose.xlu0.b32.cont [15/16] %v327_v4, 128  ;;  %v581_v37 = vpop.trf.xlu1 }
 0x214   : > { %734 = vst [vmem:[%s1261_s16 + $0x288] sm:$0xff] %v581_v37 }
 0x217   : > { %v551_v7 = vpop.trf.xlu0 }
 0x218   : > { %706 = vst [vmem:[%s1261_s16 + $0x1a8] sm:$0xff] %v551_v7  ;;  %v614_v39 = vpop.trf.xlu2 }
 0x219   : > { %768 = vst [vmem:[%s1261_s16 + $0x398] sm:$0xff] %v614_v39 }
 0x21b   : > { %636 = vxpose.xlu0.b32.end [16/16] %v332_v8, 128  ;;  %v582_v40 = vpop.trf.xlu1 }
 0x21c   : > { %736 = vst [vmem:[%s1261_s16 + $0x298] sm:$0xff] %v582_v40 }
 0x21f   : > { %v552_v11 = vpop.trf.xlu0 }
 0x220   : > { %708 = vst [vmem:[%s1261_s16 + $0x1b8] sm:$0xff] %v552_v11  ;;  %v615_v42 = vpop.trf.xlu2 }
 0x221   : > { %770 = vst [vmem:[%s1261_s16 + $0x3a8] sm:$0xff] %v615_v42 }
 0x223   : > { %v583_v43 = vpop.trf.xlu1 }
 0x224   : > { %738 = vst [vmem:[%s1261_s16 + $0x2a8] sm:$0xff] %v583_v43 }
 0x227   : > { %v553_v14 = vpop.trf.xlu0 }
 0x228   : > { %710 = vst [vmem:[%s1261_s16 + $0x1c8] sm:$0xff] %v553_v14  ;;  %v616_v45 = vpop.trf.xlu2 }
 0x229   : > { %772 = vst [vmem:[%s1261_s16 + $0x3b8] sm:$0xff] %v616_v45 }
 0x22b   : > { %v584_v46 = vpop.trf.xlu1 }
 0x22c   : > { %740 = vst [vmem:[%s1261_s16 + $0x2b8] sm:$0xff] %v584_v46 }
 0x22f   : > { %v554_v17 = vpop.trf.xlu0 }
 0x230   : > { %712 = vst [vmem:[%s1261_s16 + $0x1d8] sm:$0xff] %v554_v17  ;;  %v617_v48 = vpop.trf.xlu2 }
 0x231   : > { %774 = vst [vmem:[%s1261_s16 + $0x3c8] sm:$0xff] %v617_v48 }
 0x233   : > { %v585_v49 = vpop.trf.xlu1 }
 0x234   : > { %742 = vst [vmem:[%s1261_s16 + $0x2c8] sm:$0xff] %v585_v49 }
 0x237   : > { %v555_v20 = vpop.trf.xlu0 }
 0x238   : > { %714 = vst [vmem:[%s1261_s16 + $0x1e8] sm:$0xff] %v555_v20  ;;  %v618_v51 = vpop.trf.xlu2 }
 0x239   : > { %776 = vst [vmem:[%s1261_s16 + $0x3d8] sm:$0xff] %v618_v51 }
 0x23b   : > { %v586_v52 = vpop.trf.xlu1 }
 0x23c   : > { %744 = vst [vmem:[%s1261_s16 + $0x2d8] sm:$0xff] %v586_v52 }
 0x23f   : > { %v556_v23 = vpop.trf.xlu0 }
 0x240   : > { %716 = vst [vmem:[%s1261_s16 + $0x1f8] sm:$0xff] %v556_v23  ;;  %v619_v54 = vpop.trf.xlu2 }
 0x241   : > { %778 = vst [vmem:[%s1261_s16 + $0x3e8] sm:$0xff] %v619_v54 }
 0x243   : > { %v587_v55 = vpop.trf.xlu1 }
 0x244   : > { %746 = vst [vmem:[%s1261_s16 + $0x2e8] sm:$0xff] %v587_v55 }
 0x247   : > { %v637_v26 = vpop.trf.xlu0 }
 0x248   : > { %782 = vst [vmem:[%s1261_s16 + $0x408] sm:$0xff] %v637_v26  ;;  %v620_v57 = vpop.trf.xlu2 }
 0x249   : > { %780 = vst [vmem:[%s1261_s16 + $0x3f8] sm:$0xff] %v620_v57 }
 0x24b   : > { %v588_v58 = vpop.trf.xlu1 }
 0x24c   : > { %748 = vst [vmem:[%s1261_s16 + $0x2f8] sm:$0xff] %v588_v58 }
 0x24f   : > { %v638_v29 = vpop.trf.xlu0 }
 0x250   : > { %784 = vst [vmem:[%s1261_s16 + $0x418] sm:$0xff] %v638_v29 }
 0x257   : > { %v639_v32 = vpop.trf.xlu0 }
 0x258   : > { %786 = vst [vmem:[%s1261_s16 + $0x428] sm:$0xff] %v639_v32 }
 0x25f   : > { %v640_v35 = vpop.trf.xlu0 }
 0x260   : > { %788 = vst [vmem:[%s1261_s16 + $0x438] sm:$0xff] %v640_v35 }
 0x267   : > { %v641_v38 = vpop.trf.xlu0 }
 0x268   : > { %790 = vst [vmem:[%s1261_s16 + $0x448] sm:$0xff] %v641_v38 }
 0x26f   : > { %v642_v41 = vpop.trf.xlu0 }
 0x270   : > { %792 = vst [vmem:[%s1261_s16 + $0x458] sm:$0xff] %v642_v41 }
 0x277   : > { %v643_v44 = vpop.trf.xlu0 }
 0x278   : > { %794 = vst [vmem:[%s1261_s16 + $0x468] sm:$0xff] %v643_v44 }
 0x27f   : > { %v644_v47 = vpop.trf.xlu0 }
 0x280   : > { %796 = vst [vmem:[%s1261_s16 + $0x478] sm:$0xff] %v644_v47 }
 0x287   : > { %v645_v50 = vpop.trf.xlu0 }
 0x288   : > { %798 = vst [vmem:[%s1261_s16 + $0x488] sm:$0xff] %v645_v50 }
 0x28f   : > { %v646_v53 = vpop.trf.xlu0 }
 0x290   : > { %800 = vst [vmem:[%s1261_s16 + $0x498] sm:$0xff] %v646_v53 }
 0x297   : > { %v647_v56 = vpop.trf.xlu0 }
 0x298   : > { %802 = vst [vmem:[%s1261_s16 + $0x4a8] sm:$0xff] %v647_v56 }
 0x29f   : > { %v648_v59 = vpop.trf.xlu0 }
 0x2a0   : > { %804 = vst [vmem:[%s1261_s16 + $0x4b8] sm:$0xff] %v648_v59 }
 0x2a7   : > { %v649_v60 = vpop.trf.xlu0 }
 0x2a8   : > { %806 = vst [vmem:[%s1261_s16 + $0x4c8] sm:$0xff] %v649_v60 }
 0x2af   : > { %v650_v61 = vpop.trf.xlu0 }
 0x2b0   : > { %808 = vst [vmem:[%s1261_s16 + $0x4d8] sm:$0xff] %v650_v61 }
 0x2b7   : > { %v651_v62 = vpop.trf.xlu0 }
 0x2b8   : > { %810 = vst [vmem:[%s1261_s16 + $0x4e8] sm:$0xff] %v651_v62 }
 0x2bf   : > { %v652_v63 = vpop.trf.xlu0 }
 0x2c0   : > { %812 = vst [vmem:[%s1261_s16 + $0x4f8] sm:$0xff] %v652_v63 }
 0x2c1   : > { %1064 = shalt.err (!%p1061_p13)
}
 0x2c2   : > { %s1123_s4 = smov 256   ;;  %s1124_s5 = smov 16  }
 0x2c3   : > { %943 = dma.vmem_to_hbm [thread:$0]  (%p1186_p9), %s832_s24, 20480, %s834_s25, %s814_s26, %s1123_s4, %s1123_s4, %s1124_s5  }
 0x2c4 PF: > { %s848_s12 = sand.u32 1, %s1099_s6   ;;  %p950_p0 = pnand %p931_p12, %p1193_p11 }
 0x2c5   : > { %s849_s13 = scalar_lea.sflag [#allocation4], %s848_s12 }
 0x2c6   : > { %p951_p1 = pneg %p950_p0 }
 0x2c8   : > { %1094 = dma.done.wait (%p951_p1), %s849_s13, 20480  }
 0x2c9   : > { %1096 = vsyncadd (%p951_p1), %s849_s13, 4294946816  ;;  %s17_s11 = sadd.s32 1, %s1119_s11   ;;  %s1590_s6 = smov %s1103_s7 }
 0x2ca   : > { %p14_p2 = scmp.ge.s32.totalorder %s17_s11, 4   ;;  %s1591_s7 = smov %s1107_s8 }
 0x2cb   : > { %s1592_s8 = smov %s1191_s20  ;;  %s1593_s9 = smov %s1115_s10 }
 0x2cc   : > { %s1594_s10 = smov %s1596_s14  ;;  %16 = sbr.rel (!%p14_p2) target bundleno = 6 (0x6), region = 69 }
 0x2d1   :  { %855 = vsyncpa [#allocation3], 1 }
 0x2d2   :  { %857 = vsyncpa [#allocation3 + $0x1], 1 }
 0x2d3   :  { %858 = vsyncpa [#allocation4], 1 }
 0x2d4   :  { %860 = vsyncpa [#allocation4 + $0x1], 1 }

</bundles_post_ra>
